<compile_context>
chip_gen: v5e
topology: v5e:2x2
jax: 0.10.0
libtpu: 0.0.40
codegen_flags: <defaults>
</compile_context>

<pallas_src>
import math

import jax
import jax.numpy as jnp
from jax import lax
from jax.experimental import pallas as pl
from jax.experimental.pallas import tpu as pltpu


# ----------------------------- configuration --------------------------------

FAST_TABLE_BYTES = 4 << 20    # table must fit this VMEM budget to be resident
FAST_MAX_V = 4096             # keep one-hot MXU flops reasonable
OUT_BLOCK_BUDGET = 8 << 20    # budget for the double-buffered output block
ONEHOT_BUDGET = 2 << 20       # budget for the (TB, V) one-hot MXU operand
WAVE = 32                     # rows per DMA wave (multiple of every granule)
LEAD = 2                      # in-flight waves (bounded DMA descriptor queue)


def _round_up(x: int, m: int) -> int:
    return ((x + m - 1) // m) * m


def _compiler_params(needed_bytes: int) -> pltpu.CompilerParams:
    # Explicit scoped-VMEM limit with headroom; capped at 32 MiB so it is safe
    # on v7x (64 MiB physical) as well as v5e/v6e.
    limit = int(min(max(needed_bytes + (4 << 20), 16 << 20), 32 << 20))
    return pltpu.CompilerParams(
        dimension_semantics=("parallel",),
        vmem_limit_bytes=limit,
    )


# ------------------- fast path: VMEM-resident table, MXU gather -------------

def _make_onehot_kernel(tb: int, vocab: int, scale: float):
    def kernel(tok_ref, emb_ref, out_ref):
        # tok_ref : VMEM (tb, 1) int32   token ids for this block
        # emb_ref : VMEM (V, E)          table, resident across grid steps
        # out_ref : VMEM (tb, E)         output tile
        ids = tok_ref[...]                                        # (tb, 1)
        iota = lax.broadcasted_iota(jnp.int32, (tb, vocab), 1)    # (tb, V)
        onehot = (ids == iota).astype(emb_ref.dtype)              # exact select
        gathered = jnp.dot(onehot, emb_ref[...],
                           preferred_element_type=jnp.float32)    # (tb, E) f32
        out_ref[...] = (gathered * scale).astype(out_ref.dtype)

    return kernel


def _token_embedding_small(tok_flat, emb_table, tb: int, scale: float):
    n_pad = tok_flat.shape[0]
    V, E = emb_table.shape
    eb = jnp.dtype(emb_table.dtype).itemsize
    needed = 2 * V * E * eb + 3 * tb * E * eb + tb * V * eb + 4 * tb * 4

    return pl.pallas_call(
        _make_onehot_kernel(tb, V, scale),
        out_shape=jax.ShapeDtypeStruct((n_pad, E), emb_table.dtype),
        grid_spec=pltpu.PrefetchScalarGridSpec(
            num_scalar_prefetch=0,
            grid=(n_pad // tb,),
            in_specs=[
                pl.BlockSpec((tb, 1), lambda i: (i, 0)),
                # Grid-invariant block -> table DMA'd once, stays in VMEM.
                pl.BlockSpec((V, E), lambda i: (0, 0)),
            ],
            out_specs=pl.BlockSpec((tb, E), lambda i: (i, 0)),
        ),
        compiler_params=_compiler_params(needed),
    )(tok_flat.reshape(n_pad, 1), emb_table)


# --------------- large-table path: HBM table, wave-pipelined DMA gather -----

def _make_gather_kernel(tb: int, wave: int, lead: int, vocab: int, scale: float):
    n_waves = tb // wave

    def kernel(tok_ref, emb_hbm, out_ref, sems):
        # tok_ref : SMEM (n_pad,) int32   scalar-prefetched, clamped token ids
        # emb_hbm : HBM  (V, E)           embedding table (never fully copied)
        # out_ref : VMEM (tb, E)          output tile for this grid step
        # sems    : DMA semaphores, one per in-flight wave slot
        i = pl.program_id(0)
        base = i * tb

        def start_wave(w):
            slot = w % lead
            row0 = w * wave

            def start_row(t, c):
                tok = tok_ref[base + row0 + t]
                pltpu.make_async_copy(
                    emb_hbm.at[pl.ds(tok, 1), :],
                    out_ref.at[pl.ds(row0 + t, 1), :],
                    sems.at[slot],
                ).start()
                return c

            lax.fori_loop(0, wave, start_row, 0, unroll=True)

        def wait_wave(w):
            slot = w % lead
            off = pl.multiple_of(w * wave, wave)
            if vocab >= wave:
                # One wait for the whole wave; descriptor covers the real
                # destination rows so effect tracking sees them all.
                pltpu.make_async_copy(
                    emb_hbm.at[pl.ds(0, wave), :],
                    out_ref.at[pl.ds(off, wave), :],
                    sems.at[slot],
                ).wait()
            else:  # tiny-vocab fallback: per-row waits on the real slices
                def wait_row(t, c):
                    pltpu.make_async_copy(
                        emb_hbm.at[pl.ds(0, 1), :],
                        out_ref.at[pl.ds(off + t, 1), :],
                        sems.at[slot],
                    ).wait()
                    return c

                lax.fori_loop(0, wave, wait_row, 0, unroll=True)

        def scale_wave(w):
            off = pl.multiple_of(w * wave, wave)
            rows = out_ref[pl.ds(off, wave), :]
            out_ref[pl.ds(off, wave), :] = (
                rows.astype(jnp.float32) * scale
            ).astype(out_ref.dtype)

        # Prime up to `lead` waves of row gathers.
        for w in range(min(lead, n_waves)):
            start_wave(w)

        def step(w, c):
            wait_wave(w)              # wave w complete; its sem slot drained

            @pl.when(w + lead < n_waves)
            def _():
                start_wave(w + lead)  # refill the slot before spending VPU time

            scale_wave(w)             # scale hides under wave w+1's DMAs
            return c

        lax.fori_loop(0, n_waves, step, 0)

    return kernel


def _token_embedding_gather(tok_flat, emb_table, tb: int, scale: float):
    n_pad = tok_flat.shape[0]
    V, E = emb_table.shape
    eb = jnp.dtype(emb_table.dtype).itemsize
    wave = min(WAVE, tb)
    needed = 3 * tb * E * eb

    return pl.pallas_call(
        _make_gather_kernel(tb, wave, LEAD, V, scale),
        out_shape=jax.ShapeDtypeStruct((n_pad, E), emb_table.dtype),
        grid_spec=pltpu.PrefetchScalarGridSpec(
            num_scalar_prefetch=1,                     # token ids -> SMEM
            grid=(n_pad // tb,),
            in_specs=[
                pl.BlockSpec(memory_space=pl.ANY),     # table stays in HBM
            ],
            out_specs=pl.BlockSpec((tb, E), lambda i, tok: (i, 0)),
            scratch_shapes=[pltpu.SemaphoreType.DMA((LEAD,))],
        ),
        compiler_params=_compiler_params(needed),
    )(tok_flat, emb_table)


# --------------------------------- wrapper -----------------------------------

def token_embedding(tokens: jax.Array, emb_table: jax.Array,
                    *, force_gather: bool = False) -> jax.Array:
    """Pallas TokenEmbedding forward: emb_table[tokens] * sqrt(emb_size)."""
    lead_shape = tokens.shape
    V, E = emb_table.shape
    N = int(math.prod(lead_shape))
    eb = jnp.dtype(emb_table.dtype).itemsize
    scale = math.sqrt(float(E))

    table_bytes = V * E * eb
    use_fast = (not force_gather
                and table_bytes <= FAST_TABLE_BYTES
                and V <= FAST_MAX_V)

    # Clamp ids (no OOB gathers possible) and flatten to (N,).
    tok_flat = jnp.clip(tokens.reshape(-1).astype(jnp.int32), 0, V - 1)

    # Budget-driven token block size, multiple of 32 (covers f32/bf16/int8
    # packed sublane granules), capped so tiny inputs don't over-pad.
    tb = OUT_BLOCK_BUDGET // (2 * E * eb)
    if use_fast:
        tb = min(tb, ONEHOT_BUDGET // max(V * eb, 1))
    tb = max(32, min(2048, tb))
    tb = (tb // 32) * 32
    tb = min(tb, _round_up(N, 32))

    n_pad = _round_up(N, tb)
    if n_pad != N:
        tok_flat = jnp.pad(tok_flat, (0, n_pad - N))   # pad with valid id 0

    if use_fast:
        out_flat = _token_embedding_small(tok_flat, emb_table, tb, scale)
    else:
        out_flat = _token_embedding_gather(tok_flat, emb_table, tb, scale)

    if n_pad != N:
        out_flat = out_flat[:N]
    return out_flat.reshape(*lead_shape, E)


# TODO(synk): optional host-side token dedup (gather each unique row once) is
# not implemented; it needs dynamic shapes outside jit.

if __name__ == "__main__":
    # Small, deterministic config consistent with the module.
    vocab_size = 128
    emb_size = 128
    batch, seq = 2, 8

    key = jax.random.PRNGKey(0)
    k_emb, k_tok, k_tok2 = jax.random.split(key, 3)

    # Deterministic "parameter init" for nn.Embedding(vocab_size, emb_size).
    emb_table = jax.random.normal(k_emb, (vocab_size, emb_size), dtype=jnp.float32)
    tokens = jax.random.randint(k_tok, (batch, seq), 0, vocab_size, dtype=jnp.int32)

    ref = jnp.take(emb_table, tokens, axis=0) * math.sqrt(float(emb_size))

    # 1) Fast path: VMEM-resident table, one-hot MXU gather.
    out = jax.block_until_ready(token_embedding(tokens, emb_table))
    assert out.shape == (batch, seq, emb_size)
    assert jnp.allclose(out, ref, atol=1e-5, rtol=1e-5), "mismatch vs reference"

    # 2) Ragged shape (B*S not a multiple of 32) exercises the padding path.
    tokens2 = jax.random.randint(k_tok2, (3, 5), 0, vocab_size, dtype=jnp.int32)
    out2 = jax.block_until_ready(token_embedding(tokens2, emb_table))
    ref2 = jnp.take(emb_table, tokens2, axis=0) * math.sqrt(float(emb_size))
    assert out2.shape == (3, 5, emb_size)
    assert jnp.allclose(out2, ref2, atol=1e-5, rtol=1e-5), "mismatch (ragged)"

    # 3) Large-vocab path (HBM table, wave-pipelined row-gather DMAs), forced
    #    on the small table so both code paths are exercised.
    out3 = jax.block_until_ready(token_embedding(tokens, emb_table,
                                                 force_gather=True))
    assert jnp.allclose(out3, ref, atol=1e-5, rtol=1e-5), "mismatch (gather path)"

    print("KERNEL_OK")
</pallas_src>

<mosaic_0001>
module attributes {stable_mosaic.version = 11 : i64} {
  func.func @kernel(%arg0: i32, %arg1: memref<32x1xi32, #tpu.memory_space<vmem>>, %arg2: memref<128x128xf32, #tpu.memory_space<vmem>>, %arg3: memref<32x128xf32, #tpu.memory_space<vmem>>) attributes {dimension_semantics = [#tpu.dimension_semantics<parallel>], iteration_bounds = array<i64: 1>, scalar_prefetch = 0 : i64, scratch_operands = 0 : i64, tpu.core_type = #tpu.core_type<tc>, window_params = [{transform_indices = @transform_0, window_bounds = array<i64: 32, 1>}, {pipeline_mode = #tpu.pipeline_mode<synchronous>, transform_indices = @transform_1, window_bounds = array<i64: 128, 128>}, {transform_indices = @transform_2, window_bounds = array<i64: 32, 128>}]} {
    %c0 = arith.constant 0 : index
    %c0_0 = arith.constant 0 : index
    %0 = vector.load %arg1[%c0, %c0_0] : memref<32x1xi32, #tpu.memory_space<vmem>>, vector<32x1xi32>
    %1 = tpu.iota {dimensions = array<i32: 1>} : vector<32x128xi32>
    %2 = vector.broadcast %0 : vector<32x1xi32> to vector<32x128xi32>
    %3 = arith.cmpi eq, %2, %1 : vector<32x128xi32>
    %4 = arith.extui %3 : vector<32x128xi1> to vector<32x128xi32>
    %5 = arith.sitofp %4 : vector<32x128xi32> to vector<32x128xf32>
    %c0_1 = arith.constant 0 : index
    %c0_2 = arith.constant 0 : index
    %6 = vector.load %arg2[%c0_1, %c0_2] : memref<128x128xf32, #tpu.memory_space<vmem>>, vector<128x128xf32>
    %cst = arith.constant dense<0.000000e+00> : vector<32x128xf32>
    %7 = tpu.matmul %5, %6, %cst {dimension_numbers = #tpu.dot_dimension_numbers<[1], [0], [0], [1], [0, 0, 1, 1], [], []>} : vector<32x128xf32>, vector<128x128xf32>, vector<32x128xf32> -> vector<32x128xf32>
    %cst_3 = arith.constant 11.3137083 : f32
    %8 = vector.broadcast %cst_3 : f32 to vector<32x128xf32>
    %9 = arith.mulf %7, %8 : vector<32x128xf32>
    %c0_4 = arith.constant 0 : index
    %c0_5 = arith.constant 0 : index
    %10 = vector.load %arg3[%c0_4, %c0_5] : memref<32x128xf32, #tpu.memory_space<vmem>>, vector<32x128xf32>
    tpu.vector_store %arg3[%c0_4, %c0_5], %9 {strides = array<i32>} : memref<32x128xf32, #tpu.memory_space<vmem>>, vector<32x128xf32>,
    return
  }
  func.func @transform_0(%arg0: i32) -> (i32, i32) {
    %c0_i32 = arith.constant 0 : i32
    %c0_i32_0 = arith.constant 0 : i32
    return %arg0, %c0_i32 : i32, i32
  }
  func.func @transform_1(%arg0: i32) -> (i32, i32) {
    %c0_i32 = arith.constant 0 : i32
    %c0_i32_0 = arith.constant 0 : i32
    %c0_i32_1 = arith.constant 0 : i32
    return %c0_i32, %c0_i32_0 : i32, i32
  }
  func.func @transform_2(%arg0: i32) -> (i32, i32) {
    %c0_i32 = arith.constant 0 : i32
    %c0_i32_0 = arith.constant 0 : i32
    return %arg0, %c0_i32 : i32, i32
  }
}

</mosaic_0001>

<bundles_post_ra>
// kernel: tpu_custom_call.1
= control target key start
LH: loop header
LB: loop body
LE: loop exit
PB: predicated region body
PF: predicated region fallthrough
CT: control target
= control target key end

     0   :  { %7 = vsyncpa [#allocation3], 0  ;;  %s291_s0 = inlined_call_operand.vmem [shape: s32[32,1], index: 0, kind: input, shape index: {}]   ;;  %s292_s1 = inlined_call_operand.hbm [shape: f32[128,128], index: 1, kind: input, shape index: {}]   ;;  %s293_s2 = inlined_call_operand.hbm [shape: f32[32,128], index: 2, kind: output, shape index: {}]  }
   0x1   :  { %8 = vsyncpa [#allocation4], 0  ;;  %s15_s11 = sshll.u32 %s292_s1, 4  ;;  %s246_s12 = smov [#allocation2]   ;;  %s16_s11 = int_to_ptr.hbm [resolvable:$true] %s15_s11 }
   0x2   :  { %s17_s13 = sshll.u32 %s246_s12, 4  ;;  %s247_s14 = smov 128   ;;  %s18_s13 = int_to_ptr.vmem [resolvable:$true] %s17_s13 }
   0x3   :  { %s248_s15 = smov 8  }
   0x4   :  { %23 = dma.hbm_to_vmem [thread:$0]  %s16_s11, 2048, %s18_s13, [#allocation3], %s247_s14, %s247_s14, %s248_s15  }
   0x5   :  { %242 = dma.done.wait [#allocation3], 2048  }
   0x6   :  { %243 = vsyncadd [#allocation3], 4294965248  ;;  %v249_v0 = vmov 0   ;;  %v30_v1 = vld [vmem:[%s291_s0 + $0x10] sm:$0xff]  ;;  %v28_v2 = vld [vmem:[%s291_s0] sm:$0xff]  ;;  %v32_v21 = vlaneseq  ;;  %v250_v25 = vmov 1.0  }
   0x7   :  { %193 = vset.pattern.permute.xlu1 %v249_v0  ;;  %192 = vset.pattern.permute.xlu0 %v249_v0  ;;  %v73_v3 = vld [vmem:[#allocation2 + $0x78] sm:$0xff]  ;;  %v72_v4 = vld [vmem:[#allocation2 + $0x70] sm:$0xff]  ;;  %v71_v5 = vld [vmem:[#allocation2 + $0x68] sm:$0xff]  ;;  %s117_s26 = sshll.u32 %s293_s2, 4  ;;  %s118_s26 = int_to_ptr.hbm [resolvable:$true] %s117_s26 }
   0x8   :  { %41 = vperm.xlu0 %192, %v30_v1   ;;  %35 = vperm.xlu1 %193, %v28_v2   ;;  %v70_v6 = vld [vmem:[#allocation2 + $0x60] sm:$0xff]  ;;  %v31_v7 = vld [vmem:[%s291_s0 + $0x18] sm:$0xff]  ;;  %v29_v8 = vld [vmem:[%s291_s0 + $0x8] sm:$0xff]  ;;  %v33_v22 = vand.u32 127, %v32_v21  ;;  %s251_s0 = smov [#allocation5]  }
   0x9   :  { %139 = vmatpush.msra.mxu2 %v73_v3  ;;  %74 = vmatpush.msra.mxu0 %v73_v3  ;;  %v69_v9 = vld [vmem:[#allocation2 + $0x58] sm:$0xff]  ;;  %v68_v10 = vld [vmem:[#allocation2 + $0x50] sm:$0xff]  ;;  %v67_v11 = vld [vmem:[#allocation2 + $0x48] sm:$0xff]  ;;  %s115_s23 = sshll.u32 %s251_s0, 4  ;;  %s116_s23 = int_to_ptr.vmem [resolvable:$true] %s115_s23 }
   0xa   :  { %138 = vmatpush.msra.mxu1 %v73_v3  ;;  %140 = vmatpush.msra.mxu3 %v73_v3  ;;  %v66_v12 = vld [vmem:[#allocation2 + $0x40] sm:$0xff]  ;;  %v65_v13 = vld [vmem:[#allocation2 + $0x38] sm:$0xff]  ;;  %v64_v14 = vld [vmem:[#allocation2 + $0x30] sm:$0xff] }
   0xb   :  { %142 = vmatpush.msra.mxu2 %v72_v4  ;;  %75 = vmatpush.msra.mxu0 %v72_v4  ;;  %v63_v15 = vld [vmem:[#allocation2 + $0x28] sm:$0xff]  ;;  %v62_v16 = vld [vmem:[#allocation2 + $0x20] sm:$0xff]  ;;  %v61_v17 = vld [vmem:[#allocation2 + $0x18] sm:$0xff] }
   0xc   :  { %141 = vmatpush.msra.mxu1 %v72_v4  ;;  %143 = vmatpush.msra.mxu3 %v72_v4  ;;  %v60_v18 = vld [vmem:[#allocation2 + $0x10] sm:$0xff]  ;;  %v59_v19 = vld [vmem:[#allocation2 + $0x8] sm:$0xff]  ;;  %v58_v20 = vld [vmem:[#allocation2] sm:$0xff] }
   0xd   :  { %145 = vmatpush.msra.mxu2 %v71_v5  ;;  %76 = vmatpush.msra.mxu0 %v71_v5 }
   0xe   :  { %144 = vmatpush.msra.mxu1 %v71_v5  ;;  %146 = vmatpush.msra.mxu3 %v71_v5 }
   0xf   :  { %148 = vmatpush.msra.mxu2 %v70_v6  ;;  %77 = vmatpush.msra.mxu0 %v70_v6 }
  0x10   :  { %44 = vperm.xlu0 %192, %v31_v7   ;;  %38 = vperm.xlu1 %193, %v29_v8  }
  0x11   :  { %151 = vmatpush.msra.mxu2 %v69_v9  ;;  %147 = vmatpush.msra.mxu1 %v70_v6 }
  0x12   :  { %149 = vmatpush.msra.mxu3 %v70_v6  ;;  %78 = vmatpush.msra.mxu0 %v69_v9 }
  0x13   :  { %154 = vmatpush.msra.mxu2 %v68_v10  ;;  %150 = vmatpush.msra.mxu1 %v69_v9 }
  0x14   :  { %152 = vmatpush.msra.mxu3 %v69_v9  ;;  %79 = vmatpush.msra.mxu0 %v68_v10 }
  0x15   :  { %157 = vmatpush.msra.mxu2 %v67_v11  ;;  %153 = vmatpush.msra.mxu1 %v68_v10 }
  0x16   :  { %155 = vmatpush.msra.mxu3 %v68_v10  ;;  %80 = vmatpush.msra.mxu0 %v67_v11 }
  0x17   :  { %160 = vmatpush.msra.mxu2 %v66_v12  ;;  %156 = vmatpush.msra.mxu1 %v67_v11 }
  0x18   :  { %158 = vmatpush.msra.mxu3 %v67_v11  ;;  %81 = vmatpush.msra.mxu0 %v66_v12 }
  0x19   :  { %163 = vmatpush.msra.mxu2 %v65_v13  ;;  %159 = vmatpush.msra.mxu1 %v66_v12 }
  0x1a   :  { %161 = vmatpush.msra.mxu3 %v66_v12  ;;  %82 = vmatpush.msra.mxu0 %v65_v13 }
  0x1b   :  { %166 = vmatpush.msra.mxu2 %v64_v14  ;;  %162 = vmatpush.msra.mxu1 %v65_v13 }
  0x1c   :  { %164 = vmatpush.msra.mxu3 %v65_v13  ;;  %83 = vmatpush.msra.mxu0 %v64_v14 }
  0x1d   :  { %169 = vmatpush.msra.mxu2 %v63_v15  ;;  %165 = vmatpush.msra.mxu1 %v64_v14 }
  0x1e   :  { %167 = vmatpush.msra.mxu3 %v64_v14  ;;  %84 = vmatpush.msra.mxu0 %v63_v15 }
  0x1f   :  { %172 = vmatpush.msra.mxu2 %v62_v16  ;;  %168 = vmatpush.msra.mxu1 %v63_v15 }
  0x20   :  { %170 = vmatpush.msra.mxu3 %v63_v15  ;;  %85 = vmatpush.msra.mxu0 %v62_v16 }
  0x21   :  { %175 = vmatpush.msra.mxu2 %v61_v17  ;;  %171 = vmatpush.msra.mxu1 %v62_v16 }
  0x22   :  { %173 = vmatpush.msra.mxu3 %v62_v16  ;;  %86 = vmatpush.msra.mxu0 %v61_v17 }
  0x23   :  { %178 = vmatpush.msra.mxu2 %v60_v18  ;;  %174 = vmatpush.msra.mxu1 %v61_v17 }
  0x24   :  { %176 = vmatpush.msra.mxu3 %v61_v17  ;;  %87 = vmatpush.msra.mxu0 %v60_v18 }
  0x25   :  { %181 = vmatpush.msra.mxu2 %v59_v19  ;;  %177 = vmatpush.msra.mxu1 %v60_v18 }
  0x26   :  { %179 = vmatpush.msra.mxu3 %v60_v18  ;;  %88 = vmatpush.msra.mxu0 %v59_v19 }
  0x27   :  { %180 = vmatpush.msra.mxu1 %v59_v19  ;;  %184 = vmatpush.msra.mxu2 %v58_v20 }
  0x28   :  { %182 = vmatpush.msra.mxu3 %v59_v19  ;;  %89 = vmatpush.msra.mxu0 %v58_v20 }
  0x29   :  { %183 = vmatpush.msra.mxu1 %v58_v20 }
  0x2a   :  { %185 = vmatpush.msra.mxu3 %v58_v20 }
  0x7a   :  { %v42_v23 = vpop.permute.xlu0 %41  ;;  %v36_v24 = vpop.permute.xlu1 %35 }
  0x7b   :  { %vm48_vm0 = vcmp.eq.s32.totalorder %v42_v23, %v33_v22  ;;  %vm46_vm1 = vcmp.eq.s32.totalorder %v36_v24, %v33_v22 }
  0x7c   :  { %136 = vmatmul.msk.f32.vlgmr.msra.gmra.mxu2 %vm48_vm0, %v250_v25  ;;  %134 = vmatmul.msk.f32.vlgmr.msra.gmra.mxu0 %vm46_vm1, %v250_v25 }
  0x82   :  { %v45_v26 = vpop.permute.xlu0 %44  ;;  %v39_v27 = vpop.permute.xlu1 %38 }
  0x83   :  { %vm49_vm2 = vcmp.eq.s32.totalorder %v45_v26, %v33_v22  ;;  %vm47_vm3 = vcmp.eq.s32.totalorder %v39_v27, %v33_v22 }
  0x84   :  { %135 = vmatmul.msk.f32.vlgmr.msra.gmra.mxu1 %vm47_vm3, %v250_v25  ;;  %137 = vmatmul.msk.f32.vlgmr.msra.gmra.mxu3 %vm49_vm2, %v250_v25 }
  0xf9   :  { %v91_v28 = vpop.f32.mrf.mxu0 }
  0xfa   :  { %v103_v29 = vmul.f32 11.313708, %v91_v28 }
  0xfc   :  { %107 = vst [vmem:[#allocation5] sm:$0xff] %v103_v29 }
  0xff   :  { %v97_v30 = vpop.f32.mrf.mxu2 }
 0x100   :  { %v105_v31 = vmul.f32 11.313708, %v97_v30 }
 0x101   :  { %v94_v32 = vpop.f32.mrf.mxu1 }
 0x102   :  { %109 = vst [vmem:[#allocation5 + $0x10] sm:$0xff] %v105_v31  ;;  %v104_v33 = vmul.f32 11.313708, %v94_v32 }
 0x104   :  { %108 = vst [vmem:[#allocation5 + $0x8] sm:$0xff] %v104_v33 }
 0x107   :  { %v100_v34 = vpop.f32.mrf.mxu3 }
 0x108   :  { %v106_v35 = vmul.f32 11.313708, %v100_v34 }
 0x10a   :  { %110 = vst [vmem:[#allocation5 + $0x18] sm:$0xff] %v106_v35 }
 0x10b   :  { %123 = dma.vmem_to_hbm [thread:$0]  %s116_s23, 512, %s118_s26, [#allocation4], %s247_s14, %s247_s14, %s248_s15  }
 0x10c   :  { %244 = dma.done.wait [#allocation4], 512  }
 0x10d   :  { %245 = vsyncadd [#allocation4], 4294966784 }
 0x10e   :  { %128 = vsyncpa [#allocation3], 1 }
 0x10f   :  { %129 = vsyncpa [#allocation4], 1 }

</bundles_post_ra>
